<compile_context>
chip_gen: v7x
topology: tpu7x:2x2x1
jax: 0.10.0
libtpu: 0.0.40
codegen_flags: <defaults>
</compile_context>

<pallas_src>
import numpy as np
import jax
import jax.numpy as jnp
from jax.experimental import pallas as pl
from jax.experimental.pallas import tpu as pltpu


# ---------------------------------------------------------------------------
# Kernel.
#   xp_ref : (TM, 2*W2)  row-pairs, [even image row || odd image row]
#   mh_ref : (W2, 2*Wo)  constant horizontal Haar matrix (pair sum | pair diff),
#                        0.5 scale baked in.
#   outputs: (TM, Wo) each, order LL, LH, HL, HH.
# ---------------------------------------------------------------------------
def wavepool_kernel(xp_ref, mh_ref, ll_ref, lh_ref, hl_ref, hh_ref):
    w2 = mh_ref.shape[0]        # = 2 * Wo
    wo = mh_ref.shape[1] // 2

    xp = xp_ref[...].astype(jnp.float32)      # (TM, 2*W2)
    xe = xp[:, :w2]                            # even image rows
    xo = xp[:, w2:]                            # odd image rows

    cs = xe + xo                               # vertical sums   (VPU)
    cd = xo - xe                               # vertical diffs  (VPU)

    mh = mh_ref[...]                           # (W2, 2*Wo), f32
    r1 = jnp.dot(cs, mh, preferred_element_type=jnp.float32)   # [LL || LH]
    r2 = jnp.dot(cd, mh, preferred_element_type=jnp.float32)   # [HL || HH]

    odt = ll_ref.dtype
    ll_ref[...] = r1[:, :wo].astype(odt)
    lh_ref[...] = r1[:, wo:].astype(odt)
    hl_ref[...] = r2[:, :wo].astype(odt)
    hh_ref[...] = r2[:, wo:].astype(odt)


# ---------------------------------------------------------------------------
# Constant horizontal-compaction matrix: column k sums input columns (2k, 2k+1)
# (scaled 0.5); column Wo+k takes 0.5*(x[2k+1] - x[2k]).
# ---------------------------------------------------------------------------
def _haar_col_matrix(wo):
    w2 = 2 * wo
    m = np.zeros((w2, 2 * wo), dtype=np.float32)
    k = np.arange(wo)
    m[2 * k, k] = 0.5
    m[2 * k + 1, k] = 0.5
    m[2 * k, wo + k] = -0.5
    m[2 * k + 1, wo + k] = 0.5
    return m


# ---------------------------------------------------------------------------
# Per-chip VMEM capacity (trace-time query, cached, with a conservative fallback).
# ---------------------------------------------------------------------------
_VMEM_CAP_CACHE = None


def _vmem_capacity_bytes():
    global _VMEM_CAP_CACHE
    if _VMEM_CAP_CACHE is None:
        cap = None
        try:
            cap = getattr(pltpu.get_tpu_info(), "vmem_capacity_bytes", None)
        except Exception:
            cap = None
        _VMEM_CAP_CACHE = int(cap) if cap else 64 * 1024 * 1024
    return _VMEM_CAP_CACHE


# ---------------------------------------------------------------------------
# Row-pair (M axis) tile chooser: multiple of 8, pl.cdiv grid, and at least
# `min_blocks` grid steps so v7x's two TensorCores both get work.
# ---------------------------------------------------------------------------
def _choose_tm(M, row_bytes, target_bytes, min_blocks=4):
    tm = max(1, int(target_bytes) // max(1, int(row_bytes)))
    if M > min_blocks:
        tm = min(tm, -(-M // min_blocks))      # ceil(M / min_blocks)
    if tm >= M:
        return M                                # full axis is always legal
    tm = max(8, (tm // 8) * 8)
    return min(tm, M)


# ---------------------------------------------------------------------------
# Wrapper
# ---------------------------------------------------------------------------
def wave_pool(x):
    """x: (N, C, H, W). Returns (LL, LH, HL, HH), each (N, C, H//2, W//2)."""
    N, C, H, W = x.shape
    Ho, Wo = H // 2, W // 2
    W2 = 2 * Wo
    if H != 2 * Ho or W != W2:                 # odd H/W: truncate like VALID conv
        x = x[:, :, : 2 * Ho, :W2]

    M = N * C * Ho
    dt = x.dtype
    itemsize = jnp.dtype(dt).itemsize

    # Free, contiguous reshape: each row = [even image row || odd image row].
    xp = x.reshape(M, 2 * W2)
    mh = jnp.asarray(_haar_col_matrix(Wo))     # (W2, 2*Wo) f32, resident in VMEM

    vmem_cap = _vmem_capacity_bytes()
    # ~8 MiB input blocks on 128 MiB-VMEM chips (v5e/v6e), ~4 MiB on v7x (64 MiB).
    in_block_target = 8 * (1 << 20) if vmem_cap >= 96 * (1 << 20) else 4 * (1 << 20)
    vmem_limit = int(min(96 * (1 << 20), max(32 * (1 << 20), vmem_cap // 2)))

    TM = _choose_tm(M, 2 * W2 * itemsize, in_block_target, min_blocks=4)
    grid = (pl.cdiv(M, TM),)

    in_spec_x = pl.BlockSpec((TM, 2 * W2), lambda i: (i, 0))      # contiguous rows
    in_spec_m = pl.BlockSpec((W2, 2 * Wo), lambda i: (0, 0))      # stays resident
    out_spec = pl.BlockSpec((TM, Wo), lambda i: (i, 0))
    out_sd = jax.ShapeDtypeStruct((M, Wo), dt)

    # Real traffic / work of this path: one contiguous read of x, four subband
    # writes (same total bytes as x), plus the small constant matrix.
    bytes_accessed = int((xp.size + 4 * M * Wo) * itemsize + mh.size * 4)
    flops = int(4 * M * W2 + 8 * M * W2 * Wo)  # butterfly + 2 compaction matmuls

    ll, lh, hl, hh = pl.pallas_call(
        wavepool_kernel,
        grid=grid,
        in_specs=[in_spec_x, in_spec_m],
        out_specs=(out_spec, out_spec, out_spec, out_spec),
        out_shape=(out_sd, out_sd, out_sd, out_sd),
        compiler_params=pltpu.CompilerParams(
            dimension_semantics=("parallel",),
            vmem_limit_bytes=vmem_limit,
        ),
        cost_estimate=pl.CostEstimate(
            flops=flops, transcendentals=0, bytes_accessed=bytes_accessed),
    )(xp, mh)

    rs = lambda o: o.reshape(N, C, Ho, Wo)     # free reshape of contiguous output
    return rs(ll), rs(lh), rs(hl), rs(hh)


# ---------------------------------------------------------------------------
# Pure-JAX reference (same semantics as the PyTorch depthwise conv module).
# ---------------------------------------------------------------------------
def _haar_filters():
    """(4, 2, 2) filter bank: LL, LH, HL, HH — identical to get_wav()."""
    L = 1.0 / np.sqrt(2.0) * np.ones((1, 2))
    Hh = 1.0 / np.sqrt(2.0) * np.ones((1, 2))
    Hh[0, 0] = -Hh[0, 0]
    f_LL = np.transpose(L) * L
    f_LH = np.transpose(L) * Hh
    f_HL = np.transpose(Hh) * L
    f_HH = np.transpose(Hh) * Hh
    return jnp.asarray(np.stack([f_LL, f_LH, f_HL, f_HH]), dtype=jnp.float32)


def _depthwise_conv_ref(x, filt2x2):
    """nn.Conv2d(C, C, k=2, s=2, groups=C, bias=False) with a shared 2x2 filter."""
    N, C, H, W = x.shape
    w = jnp.broadcast_to(filt2x2[None, None, :, :], (C, 1, 2, 2)).astype(x.dtype)
    return jax.lax.conv_general_dilated(
        x, w, window_strides=(2, 2), padding="VALID",
        dimension_numbers=("NCHW", "OIHW", "NCHW"),
        feature_group_count=C)


if __name__ == "__main__":
    key = jax.random.PRNGKey(0)
    N, C, H, W = 2, 4, 16, 16
    x = jax.random.normal(key, (N, C, H, W), dtype=jnp.float32)

    outs = jax.jit(wave_pool)(x)
    outs = jax.block_until_ready(outs)

    filt = _haar_filters()
    refs = tuple(_depthwise_conv_ref(x, filt[f]) for f in range(4))
    for got, ref in zip(outs, refs):
        assert got.shape == (N, C, H // 2, W // 2)
        np.testing.assert_allclose(np.asarray(got), np.asarray(ref),
                                   rtol=1e-5, atol=1e-5)

    print("KERNEL_OK")
</pallas_src>

<mosaic_0001>
module attributes {stable_mosaic.version = 11 : i64} {
  func.func @wavepool_kernel(%arg0: i32, %arg1: memref<16x32xf32, #tpu.memory_space<vmem>>, %arg2: memref<16x16xf32, #tpu.memory_space<vmem>>, %arg3: memref<16x8xf32, #tpu.memory_space<vmem>>, %arg4: memref<16x8xf32, #tpu.memory_space<vmem>>, %arg5: memref<16x8xf32, #tpu.memory_space<vmem>>, %arg6: memref<16x8xf32, #tpu.memory_space<vmem>>) attributes {dimension_semantics = [#tpu.dimension_semantics<parallel>], iteration_bounds = array<i64: 4>, scalar_prefetch = 0 : i64, scratch_operands = 0 : i64, tpu.core_type = #tpu.core_type<tc>, window_params = [{transform_indices = @transform_0, window_bounds = array<i64: 16, 32>}, {pipeline_mode = #tpu.pipeline_mode<synchronous>, transform_indices = @transform_1, window_bounds = array<i64: 16, 16>}, {transform_indices = @transform_2, window_bounds = array<i64: 16, 8>}, {transform_indices = @transform_3, window_bounds = array<i64: 16, 8>}, {transform_indices = @transform_4, window_bounds = array<i64: 16, 8>}, {transform_indices = @transform_5, window_bounds = array<i64: 16, 8>}]} {
    %c0 = arith.constant 0 : index
    %c0_0 = arith.constant 0 : index
    %0 = vector.load %arg1[%c0, %c0_0] : memref<16x32xf32, #tpu.memory_space<vmem>>, vector<16x32xf32>
    %1 = vector.extract_strided_slice %0 {offsets = [0, 0], sizes = [16, 16], strides = [1, 1]} : vector<16x32xf32> to vector<16x16xf32>
    %2 = vector.extract_strided_slice %0 {offsets = [0, 16], sizes = [16, 16], strides = [1, 1]} : vector<16x32xf32> to vector<16x16xf32>
    %3 = arith.addf %1, %2 : vector<16x16xf32>
    %4 = arith.subf %2, %1 : vector<16x16xf32>
    %c0_1 = arith.constant 0 : index
    %c0_2 = arith.constant 0 : index
    %5 = vector.load %arg2[%c0_1, %c0_2] : memref<16x16xf32, #tpu.memory_space<vmem>>, vector<16x16xf32>
    %cst = arith.constant dense<0.000000e+00> : vector<16x16xf32>
    %6 = tpu.matmul %3, %5, %cst {dimension_numbers = #tpu.dot_dimension_numbers<[1], [0], [0], [1], [0, 0, 1, 1], [], []>} : vector<16x16xf32>, vector<16x16xf32>, vector<16x16xf32> -> vector<16x16xf32>
    %cst_3 = arith.constant dense<0.000000e+00> : vector<16x16xf32>
    %7 = tpu.matmul %4, %5, %cst_3 {dimension_numbers = #tpu.dot_dimension_numbers<[1], [0], [0], [1], [0, 0, 1, 1], [], []>} : vector<16x16xf32>, vector<16x16xf32>, vector<16x16xf32> -> vector<16x16xf32>
    %8 = vector.extract_strided_slice %6 {offsets = [0, 0], sizes = [16, 8], strides = [1, 1]} : vector<16x16xf32> to vector<16x8xf32>
    %c0_4 = arith.constant 0 : index
    %c0_5 = arith.constant 0 : index
    %9 = vector.load %arg3[%c0_4, %c0_5] : memref<16x8xf32, #tpu.memory_space<vmem>>, vector<16x8xf32>
    tpu.vector_store %arg3[%c0_4, %c0_5], %8 {strides = array<i32>} : memref<16x8xf32, #tpu.memory_space<vmem>>, vector<16x8xf32>,
    %10 = vector.extract_strided_slice %6 {offsets = [0, 8], sizes = [16, 8], strides = [1, 1]} : vector<16x16xf32> to vector<16x8xf32>
    %c0_6 = arith.constant 0 : index
    %c0_7 = arith.constant 0 : index
    %11 = vector.load %arg4[%c0_6, %c0_7] : memref<16x8xf32, #tpu.memory_space<vmem>>, vector<16x8xf32>
    tpu.vector_store %arg4[%c0_6, %c0_7], %10 {strides = array<i32>} : memref<16x8xf32, #tpu.memory_space<vmem>>, vector<16x8xf32>,
    %12 = vector.extract_strided_slice %7 {offsets = [0, 0], sizes = [16, 8], strides = [1, 1]} : vector<16x16xf32> to vector<16x8xf32>
    %c0_8 = arith.constant 0 : index
    %c0_9 = arith.constant 0 : index
    %13 = vector.load %arg5[%c0_8, %c0_9] : memref<16x8xf32, #tpu.memory_space<vmem>>, vector<16x8xf32>
    tpu.vector_store %arg5[%c0_8, %c0_9], %12 {strides = array<i32>} : memref<16x8xf32, #tpu.memory_space<vmem>>, vector<16x8xf32>,
    %14 = vector.extract_strided_slice %7 {offsets = [0, 8], sizes = [16, 8], strides = [1, 1]} : vector<16x16xf32> to vector<16x8xf32>
    %c0_10 = arith.constant 0 : index
    %c0_11 = arith.constant 0 : index
    %15 = vector.load %arg6[%c0_10, %c0_11] : memref<16x8xf32, #tpu.memory_space<vmem>>, vector<16x8xf32>
    tpu.vector_store %arg6[%c0_10, %c0_11], %14 {strides = array<i32>} : memref<16x8xf32, #tpu.memory_space<vmem>>, vector<16x8xf32>,
    return
  }
  func.func @transform_0(%arg0: i32) -> (i32, i32) {
    %c0_i32 = arith.constant 0 : i32
    %c0_i32_0 = arith.constant 0 : i32
    return %arg0, %c0_i32 : i32, i32
  }
  func.func @transform_1(%arg0: i32) -> (i32, i32) {
    %c0_i32 = arith.constant 0 : i32
    %c0_i32_0 = arith.constant 0 : i32
    %c0_i32_1 = arith.constant 0 : i32
    return %c0_i32, %c0_i32_0 : i32, i32
  }
  func.func @transform_2(%arg0: i32) -> (i32, i32) {
    %c0_i32 = arith.constant 0 : i32
    %c0_i32_0 = arith.constant 0 : i32
    return %arg0, %c0_i32 : i32, i32
  }
  func.func @transform_3(%arg0: i32) -> (i32, i32) {
    %c0_i32 = arith.constant 0 : i32
    %c0_i32_0 = arith.constant 0 : i32
    return %arg0, %c0_i32 : i32, i32
  }
  func.func @transform_4(%arg0: i32) -> (i32, i32) {
    %c0_i32 = arith.constant 0 : i32
    %c0_i32_0 = arith.constant 0 : i32
    return %arg0, %c0_i32 : i32, i32
  }
  func.func @transform_5(%arg0: i32) -> (i32, i32) {
    %c0_i32 = arith.constant 0 : i32
    %c0_i32_0 = arith.constant 0 : i32
    return %arg0, %c0_i32 : i32, i32
  }
}

</mosaic_0001>

<bundles_post_ra>
// kernel: wave_pool.1
= control target key start
LH: loop header
LB: loop body
LE: loop exit
PB: predicated region body
PF: predicated region fallthrough
CT: control target
= control target key end

     0   :  { %s1262_s0 = inlined_call_operand.vmem [shape: f32[64,32], index: 0, kind: input, shape index: {}]   ;;  %s1263_s1 = inlined_call_operand.vmem [shape: f32[16,16], index: 1, kind: input, shape index: {}]   ;;  %s1264_s2 = inlined_call_operand.hbm [shape: f32[64,8], index: 2, kind: output, shape index: {0}]   ;;  %s1265_s3 = inlined_call_operand.hbm [shape: f32[64,8], index: 3, kind: output, shape index: {1}]   ;;  %s1266_s4 = inlined_call_operand.hbm [shape: f32[64,8], index: 4, kind: output, shape index: {2}]   ;;  %s1267_s5 = inlined_call_operand.hbm [shape: f32[64,8], index: 5, kind: output, shape index: {3}]  }
   0x1   :  { %1275 = sst [smem:[#allocation12_spill]] %s1262_s0 }
   0x2   :  { %11 = vsyncpa [#allocation3], 0 }
   0x3   :  { %13 = vsyncpa [#allocation3 + $0x1], 0 }
   0x4   :  { %14 = vsyncpa [#allocation5], 0 }
   0x5   :  { %16 = vsyncpa [#allocation5 + $0x1], 0 }
   0x6   :  { %17 = vsyncpa [#allocation8], 0 }
   0x7   :  { %19 = vsyncpa [#allocation8 + $0x1], 0  ;;  %s1019_s18 = smov 0   ;;  %s1021_s19 = smov 0  }
   0x8   :  { %s1023_s20 = smov 0   ;;  %s1025_s21 = smov 0  }
   0x9 LB: > { %s1040_s22 = sadd.s32 4294967295, %s978_s21   ;;  %s1268_s23 = sadd.s32 4294967294, %s978_s21   ;;  %s978_s21 = sphi %s1025_s21, %s1286_s21   ;;  %s974_s20 = sphi %s1023_s20, %s1285_s20   ;;  %s970_s19 = sphi %s1021_s19, %s1284_s19   ;;  %s966_s18 = sphi %s1019_s18, %s1283_s18  }
   0xa   : > { %s1044_s24 = sadd.s32 1, %s978_s21   ;;  %s79_s25 = sadd.s32 1, %s974_s20 }
   0xb   : > { %s76_s26 = ssub.s32 %s978_s21, %s1044_s24  ;;  %p89_p0 = scmp.ne.s32.totalorder %s974_s20, %s970_s19 }
   0xc   : > { %p77_p1 = scmp.eq.s32.totalorder %s76_s26, 0  ;;  %p90_p2 = scmp.eq.s32.totalorder %s1040_s22, 3 }
   0xd   : > { %p95_p3 = scmp.ne.s32.totalorder %s970_s19, %s966_s18  ;;  %p96_p4 = scmp.eq.s32.totalorder %s1268_s23, 3 }
   0xe   : > { %s1057_s27 = scalar_select %p77_p1, %s974_s20, %s79_s25  }
   0xf   : > { %p1059_p5 = por %p90_p2, %p89_p0  ;;  %p1063_p6 = por %p96_p4, %p95_p3 }
  0x10   : > { %p706_p7 = scmp.ge.s32.totalorder %s978_s21, 1  ;;  %p204_p8 = scmp.lt.s32.totalorder %s978_s21, 5 }
  0x12   : > { %p205_p9 = pnand %p706_p7, %p204_p8 }
  0x13   : > { %s711_s30 = sshll.u32 (!%p205_p9), %s1040_s22, 1  ;;  %v277_v0 = vld [vmem:[%s1263_s1] sm:$0xff] (!%p205_p9)  ;;  %v278_v1 = vld [vmem:[%s1263_s1 + $0x8] sm:$0xff] (!%p205_p9)  ;;  %s1278_s0 = sld [smem:[#allocation12_spill]] (!%p205_p9)  ;;  %vm279_vm0 = vcmask (!%p205_p9), 130048   ;;  %vm446_vm1 = vcmask (!%p205_p9), 64512  }
  0x14   : > { %208 = sbr.rel (%p205_p9) target bundleno = 609 (0x261), region = 28  ;;  %p248_p10 = scmp.lt.s32.totalorder (!%p205_p9), %s711_s30, 7  ;;  %v757_v2 = vpack.c.bf16 (!%p205_p9), %v278_v1, %v277_v0 }
  0x15   : > { %s980_s14 = smov (!%p205_p9), 16   ;;  %s981_s15 = smov (!%p205_p9), 112  }
  0x16   : > { %758 = vmatprep.subr.bf16.mxu0 (!%p205_p9), %v757_v2  ;;  %762 = vmatprep.subr.bf16.mxu1 (!%p205_p9), %v757_v2  ;;  %s1080_s16 = sand.u32 (!%p205_p9), 1, %s970_s19   ;;  %s1269_s26 = smov (!%p205_p9), 120  }
  0x17   : > { %760 = vmatpush3.bf16.msra.mxu0 (!%p205_p9), %v757_v2  ;;  %764 = vmatpush3.bf16.msra.mxu1 (!%p205_p9), %v757_v2  ;;  %s1083_s17 = sshll.u32 (!%p205_p9), %s1080_s16, 4  ;;  %s1093_s6 = sshll.u32 (!%p205_p9), %s1040_s22, 8 }
  0x18   : > { %s225_s25 = scalar_lea.vmem (!%p205_p9), [#allocation2], %s1083_s17  ;;  %s1099_s9 = scalar_lea.hbm (!%p205_p9), %s1264_s2, %s1093_s6 }
  0x19   : > { %s983_s12 = smov (!%p205_p9), [#allocation2]  }
  0x1b   : > { %s1288_s30 = smov (!%p248_p10, %s711_s30), 7 }
  0x1c   : > { %s712_s10 = sshll.u32 %s1288_s30, 3  ;;  %s500_s30 = sshll.u32 %s225_s25, 4  ;;  %s1090_s30 = int_to_ptr.vmem [resolvable:$true] %s500_s30 }
  0x1d   : > { %s251_s13 = scalar_lea.vmem %s1278_s0, %s712_s10  ;;  %s472_s10 = scalar_lea.sflag [#allocation3], %s1080_s16 }
  0x1e   : > { %v257_v3 = vld [vmem:[%s251_s13] sm:$0xff]  ;;  %v258_v4 = vld [vmem:[%s251_s13 + $0x8] sm:$0xff]  ;;  %s824_s11 = scalar_lea.vmem %s1090_s30, 256  ;;  %s828_s13 = sshll.u32 %s983_s12, 4  ;;  %s829_s13 = int_to_ptr.vmem [resolvable:$false] %s828_s13 }
  0x1f   : > { %269 = vrot.lane.b32.xlu0 %v257_v3, %s980_s14  ;;  %261 = vrot.lane.b32.xlu1 %v257_v3, %s981_s15  ;;  %p825_p11 = scmp.ne.s32.totalorder %s1090_s30, %s824_s11  ;;  %p831_p0 = scmp.lt.s32.totalorder %s1090_s30, %s829_s13 }
  0x21   : > { %p826_p12 = pnand %p825_p11, %p1059_p5 }
  0x23   : > { %271 = vrot.lane.b32.xlu0 %v258_v4, %s980_s14  ;;  %263 = vrot.lane.b32.xlu1 %v258_v4, %s981_s15  ;;  %p827_p13 = pneg %p826_p12  ;;  %s830_s14 = scalar_lea.vmem %s829_s13, 512 }
  0x24   : > { %p832_p1 = scmp.lt.s32.totalorder %s830_s14, %s824_s11 }
  0x26   : > { %p833_p2 = por %p832_p1, %p831_p0 }
  0x28   : > { %p834_p3 = pnand %p833_p2, %p827_p13 }
  0x91   : > { %v270_v5 = vpop.permute.xlu0 %269  ;;  %v262_v6 = vpop.permute.xlu1 %261 }
  0x92   : > { %v275_v7 = vsub.f32 %v257_v3, %v270_v5  ;;  %v267_v8 = vadd.f32 %v262_v6, %v257_v3 }
  0x94   : > { %363 = vrot.lane.b32.xlu0 %v275_v7, %s981_s15  ;;  %747 = vmatprep.mubr.msk.f32.mxu0 %vm279_vm0, %v267_v8 }
  0x95   : > { %v272_v9 = vpop.permute.xlu0 %271  ;;  %v264_v10 = vpop.permute.xlu1 %263 }
  0x96   : > { %v276_v11 = vsub.f32 %v258_v4, %v272_v9  ;;  %v268_v12 = vadd.f32 %v264_v10, %v258_v4 }
  0x98   : > { %365 = vrot.lane.b32.xlu1 %v276_v11, %s981_s15  ;;  %748 = vmatmul.mubr.msk.f32.vlgmr.msra.gmra.mrb[0].mxu0 %vm279_vm0, %v268_v12 }
 0x106   : > { %v364_v13 = vpop.permute.xlu0 %363 }
 0x107   : > { %754 = vmatprep.mubr.msk.f32.mxu1 %vm279_vm0, %v364_v13 }
 0x10a   : > { %v366_v14 = vpop.permute.xlu1 %365 }
 0x10b   : > { %755 = vmatmul.mubr.msk.f32.vlgmr.msra.gmra.mrb[0].mxu1 %vm279_vm0, %v366_v14 }
 0x16b   : > { %v749_v15 = vpop.f32.mrb[0].mxu0 }
 0x16c   : > { %448 = vst.msk [vmem:[%s225_s25 + $0x8] sm:$0xff] %vm446_vm1, %v749_v15  ;;  %v352_v16 = vpop.f32.mrb[1].mxu0  ;;  %453 = vrot.lane.b32.xlu1 %v749_v15, %s1269_s26 }
 0x16d   : > { %447 = vst.msk [vmem:[%s225_s25] sm:$0xff] %vm446_vm1, %v352_v16  ;;  %451 = vrot.lane.b32.xlu0 %v352_v16, %s1269_s26 }
 0x16e   : > { %837 = shalt.err (!%p834_p3)
}
 0x16f   : > { %s838_s15 = scalar_lea.hbm %s1099_s9, 256  ;;  %s842_s8 = scalar_lea.hbm %s1264_s2, 1024 }
 0x170   : > { %p839_p4 = scmp.ne.s32.totalorder %s1099_s9, %s838_s15  ;;  %p843_p9 = scmp.lt.u32.totalorder %s1099_s9, %s1264_s2 }
 0x171   : > { %p844_p10 = scmp.lt.u32.totalorder %s842_s8, %s838_s15  ;;  %p846_p12 = scmp.lt.u32.totalorder %s838_s15, %s1099_s9 }
 0x172   : > { %p840_p7 = pnand %p839_p4, %p1059_p5 }
 0x173   : > { %p845_p11 = por %p844_p10, %p843_p9 }
 0x174   : > { %p841_p8 = pneg %p840_p7 }
 0x175   : > { %p847_p13 = por %p846_p12, %p845_p11 }
 0x177   : > { %p848_p0 = pnand %p847_p13, %p841_p8 }
 0x179   : > { %851 = shalt.err (!%p848_p0)
}
 0x17a   : > { %s1271_s11 = smov 128   ;;  %s1273_s14 = smov 8  }
 0x17b   : > { %765 = dma.vmem_to_hbm [thread:$0]  (%p1059_p5), %s1090_s30, 256, %s1099_s9, %s472_s10, %s1271_s11, %s1271_s11, %s1273_s14  }
 0x17c   : > { %s232_s15 = scalar_lea.vmem [#allocation4], %s1083_s17  ;;  %s476_s7 = sand.u32 1, %s1040_s22  }
 0x17d   : > { %s516_s25 = sshll.u32 %s232_s15, 4  ;;  %s239_s8 = scalar_lea.vmem [#allocation6], %s1083_s17  ;;  %s1131_s25 = int_to_ptr.vmem [resolvable:$true] %s516_s25 }
 0x17e   : > { %s532_s12 = sshll.u32 %s239_s8, 4  ;;  %s1137_s26 = scalar_lea.hbm %s1265_s3, %s1093_s6  ;;  %s1140_s12 = int_to_ptr.vmem [resolvable:$true] %s532_s12 }
 0x17f   : > { %s1279_s30 = smov 120   ;;  %s1148_s10 = scalar_lea.hbm %s1266_s4, %s1093_s6 }
 0x180   : > { %s1153_s23 = scalar_lea.sflag [#allocation5], %s476_s7  ;;  %s852_s13 = scalar_lea.vmem %s1131_s25, 256 }
 0x181   : > { %p853_p1 = scmp.ne.s32.totalorder %s1131_s25, %s852_s13  ;;  %s986_s11 = smov [#allocation4]  }
 0x182   : > { %s856_s14 = sshll.u32 %s986_s11, 4  ;;  %s857_s14 = int_to_ptr.vmem [resolvable:$false] %s856_s14 }
 0x183   : > { %p854_p2 = pnand %p853_p1, %p1059_p5  ;;  %s858_s0 = scalar_lea.vmem %s857_s14, 512 }
 0x184   : > { %p859_p4 = scmp.lt.s32.totalorder %s1131_s25, %s857_s14  ;;  %p860_p7 = scmp.lt.s32.totalorder %s858_s0, %s852_s13 }
 0x185   : > { %p855_p3 = pneg %p854_p2 }
 0x186   : > { %p861_p8 = por %p860_p7, %p859_p4 }
 0x188   : > { %p862_p9 = pnand %p861_p8, %p855_p3 }
 0x1de   : > { %v756_v17 = vpop.f32.mrb[0].mxu1  ;;  %v454_v18 = vpop.permute.xlu1 %453 }
 0x1df   : > { %460 = vst.msk [vmem:[%s239_s8 + $0x8] sm:$0xff] %vm446_vm1, %v756_v17  ;;  %465 = vrot.lane.b32.xlu1 %v756_v17, %s1279_s30  ;;  %v437_v19 = vpop.f32.mrb[1].mxu1  ;;  %458 = vst.msk [vmem:[%s232_s15 + $0x8] sm:$0xff] %vm446_vm1, %v454_v18  ;;  %v452_v20 = vpop.permute.xlu0 %451 }
 0x1e0   : > { %459 = vst.msk [vmem:[%s239_s8] sm:$0xff] %vm446_vm1, %v437_v19  ;;  %463 = vrot.lane.b32.xlu0 %v437_v19, %s1279_s30  ;;  %457 = vst.msk [vmem:[%s232_s15] sm:$0xff] %vm446_vm1, %v452_v20 }
 0x1e1   : > { %865 = shalt.err (!%p862_p9)
}
 0x1e2   : > { %s866_s15 = scalar_lea.hbm %s1137_s26, 256  ;;  %s870_s11 = scalar_lea.hbm %s1265_s3, 1024 }
 0x1e3   : > { %p867_p10 = scmp.ne.s32.totalorder %s1137_s26, %s866_s15  ;;  %p871_p13 = scmp.lt.u32.totalorder %s1137_s26, %s1265_s3 }
 0x1e4   : > { %p872_p0 = scmp.lt.u32.totalorder %s870_s11, %s866_s15  ;;  %p874_p2 = scmp.lt.u32.totalorder %s866_s15, %s1137_s26 }
 0x1e5   : > { %p868_p11 = pnand %p867_p10, %p1059_p5 }
 0x1e6   : > { %p873_p1 = por %p872_p0, %p871_p13 }
 0x1e7   : > { %p869_p12 = pneg %p868_p11 }
 0x1e8   : > { %p875_p3 = por %p874_p2, %p873_p1 }
 0x1ea   : > { %p876_p4 = pnand %p875_p3, %p869_p12 }
 0x1ec   : > { %879 = shalt.err (!%p876_p4)
}
 0x1ed   : > { %s1280_s0 = smov 8   ;;  %s1281_s22 = smov 128  }
 0x1ee   : > { %766 = dma.vmem_to_hbm [thread:$0]  (%p1059_p5), %s1131_s25, 256, %s1137_s26, %s1153_s23, %s1281_s22, %s1281_s22, %s1280_s0  }
 0x1ef   : > { %s880_s9 = scalar_lea.vmem %s1140_s12, 256  ;;  %s987_s13 = smov [#allocation6]  }
 0x1f0   : > { %p881_p7 = scmp.ne.s32.totalorder %s1140_s12, %s880_s9  ;;  %s884_s15 = sshll.u32 %s987_s13, 4  ;;  %s885_s15 = int_to_ptr.vmem [resolvable:$false] %s884_s15 }
 0x1f1   : > { %s886_s7 = scalar_lea.vmem %s885_s15, 512  ;;  %p887_p10 = scmp.lt.s32.totalorder %s1140_s12, %s885_s15 }
 0x1f2   : > { %p882_p8 = pnand %p881_p7, %p1059_p5  ;;  %p888_p11 = scmp.lt.s32.totalorder %s886_s7, %s880_s9 }
 0x1f4   : > { %p883_p9 = pneg %p882_p8  ;;  %p889_p12 = por %p888_p11, %p887_p10 }
 0x1f6   : > { %p890_p13 = pnand %p889_p12, %p883_p9 }
 0x1f8   : > { %893 = shalt.err (!%p890_p13)
}
 0x1f9   : > { %s894_s26 = scalar_lea.hbm %s1148_s10, 256  ;;  %s898_s11 = scalar_lea.hbm %s1266_s4, 1024 }
 0x1fa   : > { %p895_p0 = scmp.ne.s32.totalorder %s1148_s10, %s894_s26  ;;  %p899_p3 = scmp.lt.u32.totalorder %s1148_s10, %s1266_s4 }
 0x1fb   : > { %p900_p4 = scmp.lt.u32.totalorder %s898_s11, %s894_s26  ;;  %p902_p8 = scmp.lt.u32.totalorder %s894_s26, %s1148_s10 }
 0x1fc   : > { %p896_p1 = pnand %p895_p0, %p1059_p5 }
 0x1fd   : > { %p901_p7 = por %p900_p4, %p899_p3 }
 0x1fe   : > { %p897_p2 = pneg %p896_p1 }
 0x1ff   : > { %p903_p9 = por %p902_p8, %p901_p7 }
 0x201   : > { %p904_p10 = pnand %p903_p9, %p897_p2 }
 0x203   : > { %907 = shalt.err (!%p904_p10)
}
 0x204   : > { %767 = dma.vmem_to_hbm [thread:$0]  (%p1059_p5), %s1140_s12, 256, %s1148_s10, %s1153_s23, %s1281_s22, %s1281_s22, %s1280_s0  }
 0x205   : > { %s246_s9 = scalar_lea.vmem [#allocation7], %s1083_s17  ;;  %s1212_s26 = scalar_lea.hbm %s1267_s5, %s1093_s6 }
 0x206   : > { %s548_s13 = sshll.u32 %s246_s9, 4  ;;  %s487_s25 = scalar_lea.sflag [#allocation8], %s1080_s16  ;;  %s1206_s13 = int_to_ptr.vmem [resolvable:$true] %s548_s13 }
 0x207   : > { %s908_s12 = scalar_lea.vmem %s1206_s13, 256  ;;  %s988_s17 = smov [#allocation7]  }
 0x208   : > { %p909_p11 = scmp.ne.s32.totalorder %s1206_s13, %s908_s12  ;;  %s912_s10 = sshll.u32 %s988_s17, 4  ;;  %s913_s10 = int_to_ptr.vmem [resolvable:$false] %s912_s10 }
 0x209   : > { %s914_s23 = scalar_lea.vmem %s913_s10, 512  ;;  %p915_p0 = scmp.lt.s32.totalorder %s1206_s13, %s913_s10 }
 0x20a   : > { %p910_p12 = pnand %p909_p11, %p1059_p5  ;;  %p916_p1 = scmp.lt.s32.totalorder %s914_s23, %s908_s12 }
 0x20c   : > { %p911_p13 = pneg %p910_p12  ;;  %p917_p2 = por %p916_p1, %p915_p0 }
 0x20e   : > { %p918_p3 = pnand %p917_p2, %p911_p13 }
 0x251   : > { %v466_v21 = vpop.permute.xlu1 %465 }
 0x252   : > { %470 = vst.msk [vmem:[%s246_s9 + $0x8] sm:$0xff] %vm446_vm1, %v466_v21  ;;  %v464_v22 = vpop.permute.xlu0 %463 }
 0x253   : > { %469 = vst.msk [vmem:[%s246_s9] sm:$0xff] %vm446_vm1, %v464_v22 }
 0x254   : > { %921 = shalt.err (!%p918_p3)
}
 0x255   : > { %s922_s6 = scalar_lea.hbm %s1212_s26, 256  ;;  %s926_s30 = scalar_lea.hbm %s1267_s5, 1024 }
 0x256   : > { %p923_p4 = scmp.ne.s32.totalorder %s1212_s26, %s922_s6  ;;  %p927_p9 = scmp.lt.u32.totalorder %s1212_s26, %s1267_s5 }
 0x257   : > { %p928_p10 = scmp.lt.u32.totalorder %s926_s30, %s922_s6  ;;  %p930_p12 = scmp.lt.u32.totalorder %s922_s6, %s1212_s26 }
 0x258   : > { %p924_p7 = pnand %p923_p4, %p1059_p5 }
 0x259   : > { %p929_p11 = por %p928_p10, %p927_p9 }
 0x25a   : > { %p925_p8 = pneg %p924_p7 }
 0x25b   : > { %p931_p13 = por %p930_p12, %p929_p11 }
 0x25d   : > { %p932_p0 = pnand %p931_p13, %p925_p8 }
 0x25f   : > { %935 = shalt.err (!%p932_p0)
}
 0x260   : > { %768 = dma.vmem_to_hbm [thread:$0]  (%p1059_p5), %s1206_s13, 256, %s1212_s26, %s487_s25, %s1281_s22, %s1281_s22, %s1280_s0  }
 0x261 PF: > { %p786_p1 = scmp.ge.s32.totalorder %s978_s21, 2  ;;  %s563_s15 = sand.u32 1, %s966_s18  }
 0x262   : > { %s564_s7 = scalar_lea.sflag [#allocation3], %s563_s15 }
 0x263   : > { %p774_p2 = pnand %p786_p1, %p1063_p6 }
 0x265   : > { %953 = dma.done.wait (!%p774_p2), %s564_s7, 256  }
 0x266   : > { %955 = vsyncadd (!%p774_p2), %s564_s7, 4294967040  ;;  %s1282_s28 = sadd.s32 4294967294, %s978_s21  }
 0x267   : > { %s572_s12 = sand.u32 1, %s1282_s28  }
 0x268   : > { %s573_s17 = scalar_lea.sflag [#allocation5], %s572_s12 }
 0x269   : > { %957 = dma.done.wait (!%p774_p2), %s573_s17, 512  }
 0x26a   : > { %959 = vsyncadd (!%p774_p2), %s573_s17, 4294966784  ;;  %s591_s16 = scalar_lea.sflag [#allocation8], %s563_s15 }
 0x26b   : > { %961 = dma.done.wait (!%p774_p2), %s591_s16, 256  }
 0x26c   : > { %963 = vsyncadd (!%p774_p2), %s591_s16, 4294967040  ;;  %p22_p5 = scmp.ge.s32.totalorder %s1044_s24, 6   ;;  %s1283_s18 = smov %s970_s19 }
 0x26d   : > { %s1284_s19 = smov %s974_s20  ;;  %s1285_s20 = smov %s1057_s27 }
 0x26e   : > { %s1286_s21 = smov %s1044_s24  ;;  %24 = sbr.rel (!%p22_p5) target bundleno = 9 (0x9), region = 112 }
 0x275   :  { %596 = vsyncpa [#allocation3], 1 }
 0x276   :  { %598 = vsyncpa [#allocation3 + $0x1], 1 }
 0x277   :  { %599 = vsyncpa [#allocation5], 1 }
 0x278   :  { %601 = vsyncpa [#allocation5 + $0x1], 1 }
 0x279   :  { %602 = vsyncpa [#allocation8], 1 }
 0x27a   :  { %604 = vsyncpa [#allocation8 + $0x1], 1 }

</bundles_post_ra>
